<compile_context>
chip_gen: v7x
topology: tpu7x:2x2x1
jax: 0.10.0
libtpu: 0.0.40
codegen_flags: <defaults>
</compile_context>

<pallas_src>
import jax
import jax.numpy as jnp
from jax.experimental import pallas as pl
from jax.experimental.pallas import tpu as pltpu

EPS = 1e-14  # matches the PyTorch module's default eps


def layernorm_kernel(x_ref, gamma_ref, beta_ref, o_ref):
    # x_ref block: (1, C, tL); gamma/beta blocks: (1, C, 1)
    x = x_ref[...].astype(jnp.float32)
    mean = jnp.mean(x, axis=1, keepdims=True)                 # (1, 1, tL)
    xc = x - mean                                             # reused below
    var = jnp.mean(xc * xc, axis=1, keepdims=True) + EPS      # (1, 1, tL)
    inv_std = jax.lax.rsqrt(var)                              # EUP slot
    scale = gamma_ref[...].astype(jnp.float32) * inv_std      # (1, C, tL)
    out = xc * scale + beta_ref[...].astype(jnp.float32)
    o_ref[...] = out.astype(o_ref.dtype)


def _choose_tile_l(C, L):
    """Pick a lane-dense tile along L: multiple of 128, ~2 MiB f32 per block."""
    target_elems = (2 * 1024 * 1024) // 4            # ~2 MiB of f32
    tl = max(128, (target_elems // max(C, 1)) // 128 * 128)
    tl = min(tl, 2048)                               # keep headroom for v7x's 64 MiB VMEM
    l_pad128 = ((L + 127) // 128) * 128
    return min(tl, l_pad128)


def layer_normalization(x, gamma, beta):
    """x: (B, C, L); gamma, beta: (C, 1). Returns (B, C, L), same dtype as x."""
    B, C, L = x.shape
    tL = _choose_tile_l(C, L)
    Lp = ((L + tL - 1) // tL) * tL                   # pad L -> multiple of tile width

    x_p = x if Lp == L else jnp.pad(x, ((0, 0), (0, 0), (0, Lp - L)))
    gamma3 = gamma.reshape(1, C, 1)
    beta3 = beta.reshape(1, C, 1)

    grid = (B, Lp // tL)

    out = pl.pallas_call(
        layernorm_kernel,
        out_shape=jax.ShapeDtypeStruct((B, C, Lp), x.dtype),
        grid_spec=pltpu.PrefetchScalarGridSpec(
            num_scalar_prefetch=0,
            grid=grid,
            in_specs=[
                pl.BlockSpec((1, C, tL), lambda b, l: (b, 0, l)),
                pl.BlockSpec((1, C, 1), lambda b, l: (0, 0, 0)),
                pl.BlockSpec((1, C, 1), lambda b, l: (0, 0, 0)),
            ],
            out_specs=pl.BlockSpec((1, C, tL), lambda b, l: (b, 0, l)),
        ),
        compiler_params=pltpu.CompilerParams(
            dimension_semantics=("parallel", "parallel"),
        ),
    )(x_p, gamma3, beta3)

    if Lp != L:
        out = out[:, :, :L]
    return out


def layer_normalization_ref(x, gamma, beta):
    mean = jnp.mean(x, axis=1, keepdims=True)
    var = jnp.mean((x - mean) ** 2, axis=1, keepdims=True) + EPS
    return (x - mean) / jnp.sqrt(var) * gamma + beta


if __name__ == "__main__":
    key = jax.random.PRNGKey(0)

    # Case 1: aligned shapes (B, C, L) = (2, 8, 128)
    B, C, L = 2, 8, 128
    k1, k2 = jax.random.split(key)
    x1 = jax.random.normal(k1, (B, C, L), dtype=jnp.float32)
    gamma1 = jnp.ones((C, 1), dtype=jnp.float32)   # matches module __init__
    beta1 = jnp.zeros((C, 1), dtype=jnp.float32)

    out1 = jax.block_until_ready(layer_normalization(x1, gamma1, beta1))
    ref1 = layer_normalization_ref(x1, gamma1, beta1)
    assert out1.shape == (B, C, L)
    assert jnp.allclose(out1, ref1, atol=1e-5, rtol=1e-5), "mismatch vs reference (aligned)"

    # Case 2: unaligned L (exercises the wrapper-side lane padding), C not multiple of 8
    B2, C2, L2 = 2, 6, 200
    x2 = jax.random.normal(k2, (B2, C2, L2), dtype=jnp.float32)
    gamma2 = jnp.ones((C2, 1), dtype=jnp.float32)
    beta2 = jnp.zeros((C2, 1), dtype=jnp.float32)

    out2 = jax.block_until_ready(layer_normalization(x2, gamma2, beta2))
    ref2 = layer_normalization_ref(x2, gamma2, beta2)
    assert out2.shape == (B2, C2, L2)
    assert jnp.allclose(out2, ref2, atol=1e-5, rtol=1e-5), "mismatch vs reference (padded)"

    print("KERNEL_OK")
</pallas_src>

<mosaic_0001>
module attributes {stable_mosaic.version = 11 : i64} {
  func.func @layernorm_kernel(%arg0: i32, %arg1: i32, %arg2: memref<1x8x128xf32, #tpu.memory_space<vmem>>, %arg3: memref<1x8x1xf32, #tpu.memory_space<vmem>>, %arg4: memref<1x8x1xf32, #tpu.memory_space<vmem>>, %arg5: memref<1x8x128xf32, #tpu.memory_space<vmem>>) attributes {dimension_semantics = [#tpu.dimension_semantics<parallel>, #tpu.dimension_semantics<parallel>], iteration_bounds = array<i64: 2, 1>, scalar_prefetch = 0 : i64, scratch_operands = 0 : i64, tpu.core_type = #tpu.core_type<tc>, window_params = [{transform_indices = @transform_0, window_bounds = array<i64: 1, 8, 128>}, {pipeline_mode = #tpu.pipeline_mode<synchronous>, transform_indices = @transform_1, window_bounds = array<i64: 1, 8, 1>}, {pipeline_mode = #tpu.pipeline_mode<synchronous>, transform_indices = @transform_2, window_bounds = array<i64: 1, 8, 1>}, {transform_indices = @transform_3, window_bounds = array<i64: 1, 8, 128>}]} {
    %c0 = arith.constant 0 : index
    %c0_0 = arith.constant 0 : index
    %c0_1 = arith.constant 0 : index
    %0 = vector.load %arg2[%c0, %c0_0, %c0_1] : memref<1x8x128xf32, #tpu.memory_space<vmem>>, vector<1x8x128xf32>
    %cst = arith.constant dense<0.000000e+00> : vector<1x128xf32>
    %1 = vector.multi_reduction <add>, %0, %cst [1] : vector<1x8x128xf32> to vector<1x128xf32>
    %2 = vector.shape_cast %1 : vector<1x128xf32> to vector<1x1x128xf32>
    %cst_2 = arith.constant 8.000000e+00 : f32
    %3 = vector.broadcast %cst_2 : f32 to vector<1x1x128xf32>
    %4 = arith.divf %2, %3 : vector<1x1x128xf32>
    %5 = vector.broadcast %4 : vector<1x1x128xf32> to vector<1x8x128xf32>
    %6 = arith.subf %0, %5 : vector<1x8x128xf32>
    %7 = arith.mulf %6, %6 : vector<1x8x128xf32>
    %cst_3 = arith.constant dense<0.000000e+00> : vector<1x128xf32>
    %8 = vector.multi_reduction <add>, %7, %cst_3 [1] : vector<1x8x128xf32> to vector<1x128xf32>
    %9 = vector.shape_cast %8 : vector<1x128xf32> to vector<1x1x128xf32>
    %cst_4 = arith.constant 8.000000e+00 : f32
    %10 = vector.broadcast %cst_4 : f32 to vector<1x1x128xf32>
    %11 = arith.divf %9, %10 : vector<1x1x128xf32>
    %cst_5 = arith.constant 9.99999982E-15 : f32
    %12 = vector.broadcast %cst_5 : f32 to vector<1x1x128xf32>
    %13 = arith.addf %11, %12 : vector<1x1x128xf32>
    %14 = math.rsqrt %13 : vector<1x1x128xf32>
    %c0_6 = arith.constant 0 : index
    %c0_7 = arith.constant 0 : index
    %c0_8 = arith.constant 0 : index
    %15 = vector.load %arg3[%c0_6, %c0_7, %c0_8] : memref<1x8x1xf32, #tpu.memory_space<vmem>>, vector<1x8x1xf32>
    %16 = vector.broadcast %15 : vector<1x8x1xf32> to vector<1x8x128xf32>
    %17 = vector.broadcast %14 : vector<1x1x128xf32> to vector<1x8x128xf32>
    %18 = arith.mulf %16, %17 : vector<1x8x128xf32>
    %19 = arith.mulf %6, %18 : vector<1x8x128xf32>
    %c0_9 = arith.constant 0 : index
    %c0_10 = arith.constant 0 : index
    %c0_11 = arith.constant 0 : index
    %20 = vector.load %arg4[%c0_9, %c0_10, %c0_11] : memref<1x8x1xf32, #tpu.memory_space<vmem>>, vector<1x8x1xf32>
    %21 = vector.broadcast %20 : vector<1x8x1xf32> to vector<1x8x128xf32>
    %22 = arith.addf %19, %21 : vector<1x8x128xf32>
    %c0_12 = arith.constant 0 : index
    %c0_13 = arith.constant 0 : index
    %c0_14 = arith.constant 0 : index
    %23 = vector.load %arg5[%c0_12, %c0_13, %c0_14] : memref<1x8x128xf32, #tpu.memory_space<vmem>>, vector<1x8x128xf32>
    tpu.vector_store %arg5[%c0_12, %c0_13, %c0_14], %22 {strides = array<i32>} : memref<1x8x128xf32, #tpu.memory_space<vmem>>, vector<1x8x128xf32>,
    return
  }
  func.func @transform_0(%arg0: i32, %arg1: i32) -> (i32, i32, i32) {
    %c0_i32 = arith.constant 0 : i32
    %c0_i32_0 = arith.constant 0 : i32
    return %arg0, %c0_i32, %arg1 : i32, i32, i32
  }
  func.func @transform_1(%arg0: i32, %arg1: i32) -> (i32, i32, i32) {
    %c0_i32 = arith.constant 0 : i32
    %c0_i32_0 = arith.constant 0 : i32
    %c0_i32_1 = arith.constant 0 : i32
    %c0_i32_2 = arith.constant 0 : i32
    return %c0_i32, %c0_i32_0, %c0_i32_1 : i32, i32, i32
  }
  func.func @transform_2(%arg0: i32, %arg1: i32) -> (i32, i32, i32) {
    %c0_i32 = arith.constant 0 : i32
    %c0_i32_0 = arith.constant 0 : i32
    %c0_i32_1 = arith.constant 0 : i32
    %c0_i32_2 = arith.constant 0 : i32
    return %c0_i32, %c0_i32_0, %c0_i32_1 : i32, i32, i32
  }
  func.func @transform_3(%arg0: i32, %arg1: i32) -> (i32, i32, i32) {
    %c0_i32 = arith.constant 0 : i32
    %c0_i32_0 = arith.constant 0 : i32
    return %arg0, %c0_i32, %arg1 : i32, i32, i32
  }
}

</mosaic_0001>

<bundles_post_ra>
// kernel: tpu_custom_call.1
= control target key start
LH: loop header
LB: loop body
LE: loop exit
PB: predicated region body
PF: predicated region fallthrough
CT: control target
= control target key end

     0   :  { %8 = vsyncpa [#allocation3], 0  ;;  %s603_s0 = inlined_call_operand.vmem [shape: f32[2,8,128], index: 0, kind: input, shape index: {}]   ;;  %s604_s1 = inlined_call_operand.vmem [shape: f32[1,8,1], index: 1, kind: input, shape index: {}]   ;;  %s605_s2 = inlined_call_operand.vmem [shape: f32[1,8,1], index: 2, kind: input, shape index: {}]   ;;  %s606_s3 = inlined_call_operand.hbm [shape: f32[2,8,128], index: 3, kind: output, shape index: {}]  }
   0x1   :  { %10 = vsyncpa [#allocation3 + $0x1], 0  ;;  %s485_s12 = smov 0   ;;  %s487_s13 = smov 0  }
   0x2   :  { %s489_s14 = smov 0   ;;  %s491_s15 = smov 0  }
   0x3   :  { %s493_s16 = smov 0   ;;  %s495_s17 = smov 0  }
   0x4 LB: > { %s313_s18 = sadd.s32 4294967295, %s461_s17   ;;  %s314_s19 = sadd.s32 4294967294, %s461_s17   ;;  %s461_s17 = sphi %s495_s17, %s16_s17   ;;  %s457_s16 = sphi %s493_s16, %s613_s16   ;;  %s453_s15 = sphi %s491_s15, %s612_s15   ;;  %s449_s14 = sphi %s489_s14, %s611_s14   ;;  %s445_s13 = sphi %s487_s13, %s610_s13   ;;  %s441_s12 = sphi %s485_s12, %s609_s12  }
   0x5   : > { %s28_s20 = sadd.s32 1, %s457_s16  ;;  %s107_s21 = sadd.s32 1, %s449_s14 }
   0x6   : > { %p30_p0 = scmp.ge.s32.totalorder %s28_s20, 2  ;;  %p117_p1 = scmp.ne.s32.totalorder %s449_s14, %s445_s13 }
   0x7   : > { %p118_p2 = scmp.eq.s32.totalorder %s313_s18, 1  ;;  %p123_p3 = scmp.ne.s32.totalorder %s445_s13, %s441_s12 }
   0x8   : > { %s615_s20 = smov (%p30_p0, %s28_s20), 0  ;;  %p124_p5 = scmp.eq.s32.totalorder %s314_s19, 1 }
   0x9   : > { %p525_p4 = por %p118_p2, %p117_p1  ;;  %s102_s23 = ssub.s32 %s457_s16, %s615_s20 }
   0xa   : > { %p317_p6 = scmp.ge.s32.totalorder %s461_s17, 1  ;;  %p105_p7 = scmp.eq.s32.totalorder %s102_s23, 0 }
   0xb   : > { %p532_p8 = por %p124_p5, %p123_p3  ;;  %p158_p9 = scmp.lt.s32.totalorder %s461_s17, 3 }
   0xc   : > { %s538_s25 = scalar_select %p105_p7, %s449_s14, %s107_s21  }
   0xd   : > { %p159_p10 = pnand %p317_p6, %p158_p9 }
   0xe   : > { %v211_v0 = vld [vmem:[%s604_s1] sm:$0xff] (!%p159_p10)  ;;  %v463_v1 = vmov (!%p159_p10), 0   ;;  %p184_p11 = scmp.lt.s32.totalorder (!%p159_p10), %s453_s15, 1  ;;  %s181_s8 = sand.u32 (!%p159_p10), 1, %s445_s13  }
   0xf   : > { %162 = sbr.rel (%p159_p10) target bundleno = 164 (0xa4), region = 32  ;;  %380 = vset.pattern.permute.xlu0 (!%p159_p10), %v463_v1  ;;  %v219_v2 = vld [vmem:[%s605_s2] sm:$0xff] (!%p159_p10)  ;;  %s318_s9 = sshll.u32 (!%p159_p10), %s181_s8, 3 }
  0x10   : > { %214 = vperm.xlu0 (!%p159_p10), %380, %v211_v0   ;;  %s321_s10 = sshll.u32 (!%p159_p10), %s453_s15, 7  ;;  %s183_s11 = scalar_lea.vmem (!%p159_p10), [#allocation2], %s318_s9 }
  0x11   : > { %s242_s18 = sshll.u32 (!%p159_p10), %s183_s11, 4  ;;  %s556_s23 = scalar_lea.hbm (!%p159_p10), %s606_s3, %s321_s10  ;;  %s558_s18 = int_to_ptr.vmem [resolvable:$true] %s242_s18 }
  0x12   : > { %s228_s26 = scalar_lea.sflag (!%p159_p10), [#allocation3], %s181_s8  ;;  %s383_s27 = scalar_lea.vmem (!%p159_p10), %s558_s18, 128 }
  0x13   : > { %p384_p12 = scmp.ne.s32.totalorder (!%p159_p10), %s558_s18, %s383_s27 }
  0x14   : > { %222 = vperm.xlu0 (!%p159_p10), %380, %v219_v2  }
  0x15   : > { %p385_p13 = pnand (!%p159_p10), %p384_p12, %p525_p4 }
  0x16   : > { %s185_s30 = scalar_select %p184_p11, %s453_s15, 1 }
  0x17   : > { %p386_p0 = pneg %p385_p13  ;;  %s464_s15 = smov [#allocation2]  }
  0x18   : > { %s319_s4 = sshll.u32 %s185_s30, 3  ;;  %s387_s28 = sshll.u32 %s464_s15, 4  ;;  %s388_s28 = int_to_ptr.vmem [resolvable:$false] %s387_s28 }
  0x19   : > { %s190_s7 = scalar_lea.vmem %s603_s0, %s319_s4  ;;  %s389_s29 = scalar_lea.vmem %s388_s28, 256 }
  0x1a   : > { %v191_v3 = vld [vmem:[%s190_s7] sm:$0xff]  ;;  %p390_p1 = scmp.lt.s32.totalorder %s558_s18, %s388_s28  ;;  %p391_p2 = scmp.lt.s32.totalorder %s389_s29, %s383_s27 }
  0x1b   : > { %v192_v4 = vrot.slane %v191_v3, 4 }
  0x1c   : > { %p392_p3 = por %p391_p2, %p390_p1 }
  0x1d   : > { %v193_v5 = vadd.f32 %v192_v4, %v191_v3 }
  0x1e   : > { %p393_p5 = pnand %p392_p3, %p386_p0 }
  0x1f   : > { %v194_v6 = vrot.slane %v193_v5, 2 }
  0x21   : > { %v195_v7 = vadd.f32 %v194_v6, %v193_v5 }
  0x23   : > { %v196_v8 = vrot.slane %v195_v7, 1 }
  0x25   : > { %v197_v9 = vadd.f32 %v196_v8, %v195_v7 }
  0x27   : > { %v199_v10 = vmul.f32 0.125, %v197_v9 }
  0x29   : > { %v200_v11 = vsub.f32 %v191_v3, %v199_v10 }
  0x2b   : > { %v201_v12 = vmul.f32 %v200_v11, %v200_v11 }
  0x2d   : > { %v202_v13 = vrot.slane %v201_v12, 4 }
  0x2f   : > { %v203_v14 = vadd.f32 %v202_v13, %v201_v12 }
  0x31   : > { %v204_v15 = vrot.slane %v203_v14, 2 }
  0x33   : > { %v205_v16 = vadd.f32 %v204_v15, %v203_v14 }
  0x35   : > { %v206_v17 = vrot.slane %v205_v16, 1 }
  0x37   : > { %v207_v18 = vadd.f32 %v206_v17, %v205_v16 }
  0x39   : > { %v208_v19 = vmul.f32 0.125, %v207_v18 }
  0x3b   : > { %v209_v20 = vadd.f32 1e-14, %v208_v19 }
  0x3d   : > { %381 = vrsqrt.f32 %v209_v20 }
  0x47   : > { %v382_v21 = vpop.eup %381 }
  0x8f   : > { %v215_v22 = vpop.permute.xlu0 %214 }
  0x90   : > { %v217_v23 = vmul.f32 %v382_v21, %v215_v22 }
  0x92   : > { %v218_v24 = vmul.f32 %v217_v23, %v200_v11 }
  0x93   : > { %v223_v25 = vpop.permute.xlu0 %222 }
  0x94   : > { %v225_v26 = vadd.f32 %v223_v25, %v218_v24 }
  0x96   : > { %226 = vst [vmem:[%s183_s11] sm:$0xff] %v225_v26 }
  0x97   : > { %396 = shalt.err (!%p393_p5)
}
  0x98   : > { %s397_s30 = scalar_lea.hbm %s556_s23, 128  ;;  %s401_s6 = scalar_lea.hbm %s606_s3, 256 }
  0x99   : > { %p398_p6 = scmp.ne.s32.totalorder %s556_s23, %s397_s30  ;;  %p402_p10 = scmp.lt.u32.totalorder %s556_s23, %s606_s3 }
  0x9a   : > { %p403_p11 = scmp.lt.u32.totalorder %s401_s6, %s397_s30  ;;  %p405_p13 = scmp.lt.u32.totalorder %s397_s30, %s556_s23 }
  0x9b   : > { %p399_p7 = pnand %p398_p6, %p525_p4 }
  0x9c   : > { %p404_p12 = por %p403_p11, %p402_p10 }
  0x9d   : > { %p400_p9 = pneg %p399_p7 }
  0x9e   : > { %p406_p0 = por %p405_p13, %p404_p12 }
  0xa0   : > { %p407_p1 = pnand %p406_p0, %p400_p9 }
  0xa2   : > { %410 = shalt.err (!%p407_p1)
}
  0xa3   : > { %324 = dma.vmem_to_hbm [thread:$0]  (%p525_p4), %s558_s18, 128, %s556_s23, %s228_s26  }
  0xa4 PF: > { %p330_p2 = scmp.ge.s32.totalorder %s461_s17, 2  ;;  %s254_s9 = sand.u32 1, %s441_s12  }
  0xa5   : > { %s255_s10 = scalar_lea.sflag [#allocation3], %s254_s9 }
  0xa6   : > { %p327_p3 = pnand %p330_p2, %p532_p8 }
  0xa8   : > { %436 = dma.done.wait (!%p327_p3), %s255_s10, 128  }
  0xa9   : > { %438 = vsyncadd (!%p327_p3), %s255_s10, 4294967168  ;;  %s16_s17 = sadd.s32 1, %s461_s17   ;;  %s609_s12 = smov %s445_s13 }
  0xaa   : > { %p13_p5 = scmp.ge.s32.totalorder %s16_s17, 4   ;;  %s610_s13 = smov %s449_s14 }
  0xab   : > { %s611_s14 = smov %s538_s25  ;;  %s612_s15 = smov %s457_s16 }
  0xac   : > { %s613_s16 = smov %s615_s20  ;;  %15 = sbr.rel (!%p13_p5) target bundleno = 4 (0x4), region = 67 }
  0xb3   :  { %260 = vsyncpa [#allocation3], 1 }
  0xb4   :  { %262 = vsyncpa [#allocation3 + $0x1], 1 }

</bundles_post_ra>
